<compile_context>
chip_gen: v7x
topology: tpu7x:2x2x1
jax: 0.10.0
libtpu: 0.0.40
codegen_flags: <defaults>
</compile_context>

<pallas_src>
import functools

import jax
import jax.numpy as jnp
from jax.experimental import pallas as pl
from jax.experimental.pallas import tpu as pltpu

EPS = 0.01


# --------------------------------------------------------------------------
# Kernel 1: project_pts  (grid = (bs, N // Tn), fully parallel)
# --------------------------------------------------------------------------
def _project_kernel(m_ref, xy_ref, pts_ref, sampler_ref):
    b = pl.program_id(0)

    x = xy_ref[0:1, :]                              # (1, Tn)
    y = xy_ref[1:2, :]                              # (1, Tn)
    d = pts_ref[0].astype(jnp.float32)              # (1, Tn) predicted depth

    # projected_coors = xyzs * pts3D with rays (x, -y, -1, 1); last row forced to 1.
    p0 = x * d
    p1 = -(y * d)
    p2 = -d
    # p3 == 1 (handled by the constant column of M below)

    # Pre-composed camera matrix M = K @ RTinv_cam2 @ RTinv_cam1 @ K_inv, read as
    # scalars from SMEM (cheap splat-broadcast, no VMEM 4x4 tile).
    def m(r, c):
        return m_ref[b, 4 * r + c]

    x0 = m(0, 0) * p0 + m(0, 1) * p1 + m(0, 2) * p2 + m(0, 3)
    x1 = m(1, 0) * p0 + m(1, 1) * p1 + m(1, 2) * p2 + m(1, 3)
    x2 = m(2, 0) * p0 + m(2, 1) * p1 + m(2, 2) * p2 + m(2, 3)

    mask = jnp.abs(x2) < EPS
    zs = jnp.where(mask, EPS, x2)                   # zs[mask] = EPS
    s0 = jnp.where(mask, -10.0, x0 / zs)            # * +1
    s1 = jnp.where(mask, -10.0, x1 / zs) * -1.0
    s2 = jnp.where(mask, -10.0, zs) * -1.0

    # direct row stores (no concatenate / sublane shuffle)
    sampler_ref[0, 0:1, :] = s0
    sampler_ref[0, 1:2, :] = s1
    sampler_ref[0, 2:3, :] = s2


# --------------------------------------------------------------------------
# Kernel 2: splatter  (grid = (bs, P // Tp, N // Tn); N-axis is the reduction)
# --------------------------------------------------------------------------
def _splat_kernel(W, sampler_ref, alpha_ref, src_ref, feat_ref):
    p = pl.program_id(1)
    n = pl.program_id(2)
    Tp = feat_ref.shape[2]
    Tn = src_ref.shape[2]

    @pl.when(n == 0)
    def _init():
        feat_ref[...] = jnp.zeros_like(feat_ref)

    # TODO(synk): RasterizePointsXYsBlending (pytorch3d z-buffer top-K + radius/tau
    # alpha compositing) has no clean Pallas equivalent; implemented as a
    # nearest-pixel, alpha-weighted accumulation splat via a 0/1 one-hot matmul.
    s0 = sampler_ref[0, 0:1, :]                                   # (1, Tn) f32
    s1 = sampler_ref[0, 1:2, :]
    scale = (W - 1) * 0.5
    px = jnp.floor((s0 + 1.0) * scale + 0.5).astype(jnp.int32)    # (1, Tn)
    py = jnp.floor((s1 + 1.0) * scale + 0.5).astype(jnp.int32)
    valid = (px >= 0) & (px < W) & (py >= 0) & (py < W)
    pidx = py * W + px                                            # global pixel id
    local = pidx - p * Tp                                         # row within this pixel tile

    # pure 0/1 one-hot (exact in bf16); invalid points may alias a pixel here but
    # their feature column is zeroed below, so they contribute nothing.
    pix_row = jax.lax.broadcasted_iota(jnp.int32, (Tp, Tn), 0)
    onehot = (pix_row == local).astype(jnp.bfloat16)              # (Tp, Tn)

    alpha = alpha_ref[0].astype(jnp.float32)                      # (1, Tn)
    wts = jnp.where(valid, alpha, 0.0)
    src_w = (src_ref[0].astype(jnp.float32) * wts).astype(jnp.bfloat16)   # (C, Tn)

    feat_ref[0] += jax.lax.dot_general(
        src_w, onehot, (((1,), (1,)), ((), ())),
        preferred_element_type=jnp.float32)                       # (C, Tp) f32 accumulate


# --------------------------------------------------------------------------
# Wrapper
# --------------------------------------------------------------------------
def _pick_tile(total, cap):
    """Largest multiple of 128 that divides `total` and is <= cap, else `total`."""
    if total <= cap:
        return total
    t = (min(cap, total) // 128) * 128
    while t >= 128:
        if total % t == 0:
            return t
        t -= 128
    return total


def pts_manipulator_forward(W, alphas, src, pred_pts, K, K_inv,
                            RT_cam1, RTinv_cam1, RT_cam2, RTinv_cam2,
                            *, tile_n=None, tile_p=None):
    """Forward pass of PtsManipulator. Returns (splatted NCHW image, pointcloud)."""
    del RT_cam1, RT_cam2  # unused by project_pts (only the inverses are used)
    bs, C, h, w = src.shape
    N = h * w
    P = W * W
    assert N == P, "source spatial size must match the splat target size W*W"

    # native dtypes (no wrapper up-cast)
    src_flat = src.reshape(bs, C, N)
    pred_flat = pred_pts.reshape(bs, 1, N)
    alpha_flat = alphas.reshape(bs, 1, N)

    # Pre-compose the camera chain (mathematically identical to the bmm chain).
    f32 = jnp.float32
    M = (K.astype(f32) @ (RTinv_cam2.astype(f32)
                          @ (RTinv_cam1.astype(f32) @ K_inv.astype(f32))))
    M_flat = M.reshape(bs, 16)                       # -> SMEM scalar table

    # xy grid (row-major flatten: n = row*W + col), matching the PyTorch xyzs buffer.
    lin = (jnp.linspace(0.0, W - 1, W, dtype=f32) / float(W - 1)) * 2.0 - 1.0
    xs = jnp.tile(lin[None, :], (W, 1)).reshape(-1)
    ys = jnp.tile(lin[:, None], (1, W)).reshape(-1)
    xy = jnp.stack([xs, ys], axis=0)                 # (2, N); kernel applies the -y sign

    if tile_n is None:
        tile_n = _pick_tile(N, 1024)
    if tile_p is None:
        tile_p = _pick_tile(P, 512)                  # half-size default is v7x-safe
    assert N % tile_n == 0 and P % tile_p == 0
    n_n = N // tile_n
    n_p = P // tile_p

    # ---- projection kernel ----
    sampler = pl.pallas_call(
        _project_kernel,
        out_shape=jax.ShapeDtypeStruct((bs, 3, N), jnp.float32),
        grid=(bs, n_n),
        in_specs=[
            pl.BlockSpec(memory_space=pltpu.MemorySpace.SMEM),          # M (bs,16)
            pl.BlockSpec((2, tile_n), lambda b, n: (0, n)),             # xy grid
            pl.BlockSpec((1, 1, tile_n), lambda b, n: (b, 0, n)),       # pred_pts
        ],
        out_specs=pl.BlockSpec((1, 3, tile_n), lambda b, n: (b, 0, n)),
        compiler_params=pltpu.CompilerParams(
            dimension_semantics=("parallel", "parallel")),
    )(M_flat, xy, pred_flat)

    # ---- splat kernel ----
    feat = pl.pallas_call(
        functools.partial(_splat_kernel, W),
        out_shape=jax.ShapeDtypeStruct((bs, C, P), jnp.float32),
        grid=(bs, n_p, n_n),
        in_specs=[
            pl.BlockSpec((1, 3, tile_n), lambda b, p, n: (b, 0, n)),    # sampler
            pl.BlockSpec((1, 1, tile_n), lambda b, p, n: (b, 0, n)),    # alphas
            pl.BlockSpec((1, C, tile_n), lambda b, p, n: (b, 0, n)),    # src
        ],
        out_specs=pl.BlockSpec((1, C, tile_p), lambda b, p, n: (b, 0, p)),
        compiler_params=pltpu.CompilerParams(
            dimension_semantics=("parallel", "parallel", "arbitrary"),
            vmem_limit_bytes=32 * 1024 * 1024),
    )(sampler, alpha_flat, src_flat)

    pointcloud = jnp.transpose(sampler, (0, 2, 1))   # pts3D.permute(0, 2, 1) -> (bs, N, 3)
    result = feat.reshape(bs, C, W, W)               # NCHW
    return result, pointcloud


# --------------------------------------------------------------------------
# Demo + self-check
# --------------------------------------------------------------------------
if __name__ == "__main__":
    key = jax.random.PRNGKey(0)
    W = 16          # image size (and splat target size)
    bs, C = 2, 4

    k1, k2, k3, k4, k5, k6 = jax.random.split(key, 6)
    src = jax.random.normal(k1, (bs, C, W, W), jnp.float32)
    pred_pts = 1.0 + 4.0 * jax.random.uniform(k2, (bs, 1, W, W), jnp.float32)
    alphas = jax.random.uniform(k3, (bs, 1, W, W), jnp.float32)

    def rand_cam(k):
        return (jnp.eye(4, dtype=jnp.float32)[None]
                + 0.05 * jax.random.normal(k, (bs, 4, 4), jnp.float32))

    K = rand_cam(k4)
    K_inv = jnp.linalg.inv(K)
    RT_cam1 = rand_cam(k5)
    RTinv_cam1 = jnp.linalg.inv(RT_cam1)
    RT_cam2 = rand_cam(k6)
    RTinv_cam2 = jnp.linalg.inv(RT_cam2)

    # small tiles to exercise the pixel/point tiling + accumulation path
    result, pointcloud = pts_manipulator_forward(
        W, alphas, src, pred_pts, K, K_inv,
        RT_cam1, RTinv_cam1, RT_cam2, RTinv_cam2, tile_n=128, tile_p=128)
    jax.block_until_ready(result)
    jax.block_until_ready(pointcloud)

    assert result.shape == (bs, C, W, W)
    assert pointcloud.shape == (bs, W * W, 3)
    assert jnp.all(jnp.isfinite(result)) and jnp.all(jnp.isfinite(pointcloud))

    # ---- pure-JAX reference: project_pts exactly as the PyTorch chain ----
    N = W * W
    lin = (jnp.linspace(0.0, W - 1, W) / float(W - 1)) * 2.0 - 1.0
    xs = jnp.tile(lin[None, :], (W, 1)).reshape(-1)
    ys = jnp.tile(lin[:, None], (1, W)).reshape(-1)
    xyzs = jnp.stack([xs, -ys, -jnp.ones((N,)), jnp.ones((N,))], 0)     # (4, N)
    pred_flat = pred_pts.reshape(bs, 1, N)
    proj = xyzs[None] * pred_flat
    proj = proj.at[:, 3, :].set(1.0)
    cam1 = jnp.einsum('bij,bjn->bin', K_inv, proj)
    RT = jnp.einsum('bij,bjk->bik', RTinv_cam2, RTinv_cam1)
    wrld = jnp.einsum('bij,bjn->bin', RT, cam1)
    xy_proj = jnp.einsum('bij,bjn->bin', K, wrld)
    z = xy_proj[:, 2:3, :]
    mask = jnp.abs(z) < EPS
    zs = jnp.where(mask, EPS, z)
    samp = jnp.concatenate([xy_proj[:, 0:2, :] / zs, zs], axis=1)
    samp = jnp.where(jnp.repeat(mask, 3, axis=1), -10.0, samp)
    samp = samp * jnp.array([1.0, -1.0, -1.0])[None, :, None]
    ref_pc = jnp.transpose(samp, (0, 2, 1))
    assert jnp.allclose(pointcloud, ref_pc, rtol=1e-3, atol=1e-3), "projection mismatch"

    # ---- reference splat (nearest-pixel alpha accumulation) from kernel sampler ----
    s0 = pointcloud[..., 0]
    s1 = pointcloud[..., 1]
    scale = (W - 1) * 0.5
    px = jnp.floor((s0 + 1.0) * scale + 0.5).astype(jnp.int32)
    py = jnp.floor((s1 + 1.0) * scale + 0.5).astype(jnp.int32)
    valid = (px >= 0) & (px < W) & (py >= 0) & (py < W)
    pidx = py * W + px
    wts = jnp.where(valid, alphas.reshape(bs, N), 0.0)
    onehot = (pidx[:, None, :] == jnp.arange(N)[None, :, None]).astype(jnp.float32)
    ref_feat = jnp.einsum('bcn,bpn->bcp',
                          src.reshape(bs, C, N) * wts[:, None, :],
                          onehot).reshape(bs, C, W, W)
    assert jnp.allclose(result, ref_feat, rtol=5e-2, atol=5e-2), "splat mismatch"

    print("KERNEL_OK")
</pallas_src>

<mosaic_0001>
module attributes {stable_mosaic.version = 11 : i64} {
  func.func @_project_kernel(%arg0: i32, %arg1: i32, %arg2: memref<2x16xf32, #tpu.memory_space<smem>>, %arg3: memref<2x128xf32, #tpu.memory_space<vmem>>, %arg4: memref<1x1x128xf32, #tpu.memory_space<vmem>>, %arg5: memref<1x3x128xf32, #tpu.memory_space<vmem>>) attributes {dimension_semantics = [#tpu.dimension_semantics<parallel>, #tpu.dimension_semantics<parallel>], iteration_bounds = array<i64: 2, 2>, scalar_prefetch = 0 : i64, scratch_operands = 0 : i64, tpu.core_type = #tpu.core_type<tc>, window_params = [{transform_indices = @transform_0, window_bounds = array<i64: 2, 16>}, {transform_indices = @transform_1, window_bounds = array<i64: 2, 128>}, {transform_indices = @transform_2, window_bounds = array<i64: 1, 1, 128>}, {transform_indices = @transform_3, window_bounds = array<i64: 1, 3, 128>}]} {
    %c0 = arith.constant 0 : index
    %c0_0 = arith.constant 0 : index
    %0 = vector.load %arg3[%c0, %c0_0] : memref<2x128xf32, #tpu.memory_space<vmem>>, vector<1x128xf32>
    %c1 = arith.constant 1 : index
    %c0_1 = arith.constant 0 : index
    %1 = vector.load %arg3[%c1, %c0_1] : memref<2x128xf32, #tpu.memory_space<vmem>>, vector<1x128xf32>
    %c0_2 = arith.constant 0 : index
    %c0_3 = arith.constant 0 : index
    %c0_4 = arith.constant 0 : index
    %2 = vector.load %arg4[%c0_2, %c0_3, %c0_4] : memref<1x1x128xf32, #tpu.memory_space<vmem>>, vector<1x1x128xf32>
    %3 = vector.shape_cast %2 : vector<1x1x128xf32> to vector<1x128xf32>
    %4 = arith.mulf %0, %3 : vector<1x128xf32>
    %5 = arith.mulf %1, %3 : vector<1x128xf32>
    %cst = arith.constant 0.000000e+00 : f32
    %6 = vector.broadcast %cst : f32 to vector<1x128xf32>
    %7 = arith.subf %6, %5 : vector<1x128xf32>
    %cst_5 = arith.constant 0.000000e+00 : f32
    %8 = vector.broadcast %cst_5 : f32 to vector<1x128xf32>
    %9 = arith.subf %8, %3 : vector<1x128xf32>
    %10 = arith.index_cast %arg0 : i32 to index
    %c0_6 = arith.constant 0 : index
    %11 = memref.load %arg2[%10, %c0_6] : memref<2x16xf32, #tpu.memory_space<smem>>
    %12 = vector.broadcast %11 : f32 to vector<1x128xf32>
    %13 = arith.mulf %12, %4 : vector<1x128xf32>
    %14 = arith.index_cast %arg0 : i32 to index
    %c1_7 = arith.constant 1 : index
    %15 = memref.load %arg2[%14, %c1_7] : memref<2x16xf32, #tpu.memory_space<smem>>
    %16 = vector.broadcast %15 : f32 to vector<1x128xf32>
    %17 = arith.mulf %16, %7 : vector<1x128xf32>
    %18 = arith.addf %13, %17 : vector<1x128xf32>
    %19 = arith.index_cast %arg0 : i32 to index
    %c2 = arith.constant 2 : index
    %20 = memref.load %arg2[%19, %c2] : memref<2x16xf32, #tpu.memory_space<smem>>
    %21 = vector.broadcast %20 : f32 to vector<1x128xf32>
    %22 = arith.mulf %21, %9 : vector<1x128xf32>
    %23 = arith.addf %18, %22 : vector<1x128xf32>
    %24 = arith.index_cast %arg0 : i32 to index
    %c3 = arith.constant 3 : index
    %25 = memref.load %arg2[%24, %c3] : memref<2x16xf32, #tpu.memory_space<smem>>
    %26 = vector.broadcast %25 : f32 to vector<1x128xf32>
    %27 = arith.addf %23, %26 : vector<1x128xf32>
    %28 = arith.index_cast %arg0 : i32 to index
    %c4 = arith.constant 4 : index
    %29 = memref.load %arg2[%28, %c4] : memref<2x16xf32, #tpu.memory_space<smem>>
    %30 = vector.broadcast %29 : f32 to vector<1x128xf32>
    %31 = arith.mulf %30, %4 : vector<1x128xf32>
    %32 = arith.index_cast %arg0 : i32 to index
    %c5 = arith.constant 5 : index
    %33 = memref.load %arg2[%32, %c5] : memref<2x16xf32, #tpu.memory_space<smem>>
    %34 = vector.broadcast %33 : f32 to vector<1x128xf32>
    %35 = arith.mulf %34, %7 : vector<1x128xf32>
    %36 = arith.addf %31, %35 : vector<1x128xf32>
    %37 = arith.index_cast %arg0 : i32 to index
    %c6 = arith.constant 6 : index
    %38 = memref.load %arg2[%37, %c6] : memref<2x16xf32, #tpu.memory_space<smem>>
    %39 = vector.broadcast %38 : f32 to vector<1x128xf32>
    %40 = arith.mulf %39, %9 : vector<1x128xf32>
    %41 = arith.addf %36, %40 : vector<1x128xf32>
    %42 = arith.index_cast %arg0 : i32 to index
    %c7 = arith.constant 7 : index
    %43 = memref.load %arg2[%42, %c7] : memref<2x16xf32, #tpu.memory_space<smem>>
    %44 = vector.broadcast %43 : f32 to vector<1x128xf32>
    %45 = arith.addf %41, %44 : vector<1x128xf32>
    %46 = arith.index_cast %arg0 : i32 to index
    %c8 = arith.constant 8 : index
    %47 = memref.load %arg2[%46, %c8] : memref<2x16xf32, #tpu.memory_space<smem>>
    %48 = vector.broadcast %47 : f32 to vector<1x128xf32>
    %49 = arith.mulf %48, %4 : vector<1x128xf32>
    %50 = arith.index_cast %arg0 : i32 to index
    %c9 = arith.constant 9 : index
    %51 = memref.load %arg2[%50, %c9] : memref<2x16xf32, #tpu.memory_space<smem>>
    %52 = vector.broadcast %51 : f32 to vector<1x128xf32>
    %53 = arith.mulf %52, %7 : vector<1x128xf32>
    %54 = arith.addf %49, %53 : vector<1x128xf32>
    %55 = arith.index_cast %arg0 : i32 to index
    %c10 = arith.constant 10 : index
    %56 = memref.load %arg2[%55, %c10] : memref<2x16xf32, #tpu.memory_space<smem>>
    %57 = vector.broadcast %56 : f32 to vector<1x128xf32>
    %58 = arith.mulf %57, %9 : vector<1x128xf32>
    %59 = arith.addf %54, %58 : vector<1x128xf32>
    %60 = arith.index_cast %arg0 : i32 to index
    %c11 = arith.constant 11 : index
    %61 = memref.load %arg2[%60, %c11] : memref<2x16xf32, #tpu.memory_space<smem>>
    %62 = vector.broadcast %61 : f32 to vector<1x128xf32>
    %63 = arith.addf %59, %62 : vector<1x128xf32>
    %64 = math.absf %63 : vector<1x128xf32>
    %cst_8 = arith.constant 0.00999999977 : f32
    %65 = vector.broadcast %cst_8 : f32 to vector<1x128xf32>
    %66 = arith.cmpf olt, %64, %65 : vector<1x128xf32>
    %cst_9 = arith.constant 0.00999999977 : f32
    %67 = vector.broadcast %cst_9 : f32 to vector<1x128xf32>
    %68 = arith.select %66, %67, %63 : vector<1x128xi1>, vector<1x128xf32>
    %69 = arith.divf %27, %68 : vector<1x128xf32>
    %cst_10 = arith.constant -1.000000e+01 : f32
    %70 = vector.broadcast %cst_10 : f32 to vector<1x128xf32>
    %71 = arith.select %66, %70, %69 : vector<1x128xi1>, vector<1x128xf32>
    %72 = arith.divf %45, %68 : vector<1x128xf32>
    %cst_11 = arith.constant -1.000000e+01 : f32
    %73 = vector.broadcast %cst_11 : f32 to vector<1x128xf32>
    %74 = arith.select %66, %73, %72 : vector<1x128xi1>, vector<1x128xf32>
    %cst_12 = arith.constant -1.000000e+00 : f32
    %75 = vector.broadcast %cst_12 : f32 to vector<1x128xf32>
    %76 = arith.mulf %74, %75 : vector<1x128xf32>
    %cst_13 = arith.constant -1.000000e+01 : f32
    %77 = vector.broadcast %cst_13 : f32 to vector<1x128xf32>
    %78 = arith.select %66, %77, %68 : vector<1x128xi1>, vector<1x128xf32>
    %cst_14 = arith.constant -1.000000e+00 : f32
    %79 = vector.broadcast %cst_14 : f32 to vector<1x128xf32>
    %80 = arith.mulf %78, %79 : vector<1x128xf32>
    %c0_15 = arith.constant 0 : index
    %c0_16 = arith.constant 0 : index
    %c0_17 = arith.constant 0 : index
    %81 = vector.load %arg5[%c0_15, %c0_16, %c0_17] : memref<1x3x128xf32, #tpu.memory_space<vmem>>, vector<1x1x128xf32>
    %82 = vector.shape_cast %81 : vector<1x1x128xf32> to vector<1x128xf32>
    %83 = vector.shape_cast %71 : vector<1x128xf32> to vector<1x1x128xf32>
    tpu.vector_store %arg5[%c0_15, %c0_16, %c0_17], %83 {strides = array<i32>} : memref<1x3x128xf32, #tpu.memory_space<vmem>>, vector<1x1x128xf32>,
    %c0_18 = arith.constant 0 : index
    %c1_19 = arith.constant 1 : index
    %c0_20 = arith.constant 0 : index
    %84 = vector.load %arg5[%c0_18, %c1_19, %c0_20] : memref<1x3x128xf32, #tpu.memory_space<vmem>>, vector<1x1x128xf32>
    %85 = vector.shape_cast %84 : vector<1x1x128xf32> to vector<1x128xf32>
    %86 = vector.shape_cast %76 : vector<1x128xf32> to vector<1x1x128xf32>
    tpu.vector_store %arg5[%c0_18, %c1_19, %c0_20], %86 {strides = array<i32>} : memref<1x3x128xf32, #tpu.memory_space<vmem>>, vector<1x1x128xf32>,
    %c0_21 = arith.constant 0 : index
    %c2_22 = arith.constant 2 : index
    %c0_23 = arith.constant 0 : index
    %87 = vector.load %arg5[%c0_21, %c2_22, %c0_23] : memref<1x3x128xf32, #tpu.memory_space<vmem>>, vector<1x1x128xf32>
    %88 = vector.shape_cast %87 : vector<1x1x128xf32> to vector<1x128xf32>
    %89 = vector.shape_cast %80 : vector<1x128xf32> to vector<1x1x128xf32>
    tpu.vector_store %arg5[%c0_21, %c2_22, %c0_23], %89 {strides = array<i32>} : memref<1x3x128xf32, #tpu.memory_space<vmem>>, vector<1x1x128xf32>,
    return
  }
  func.func @transform_0(%arg0: i32, %arg1: i32) -> (i32, i32) {
    %c0_i32 = arith.constant 0 : i32
    %c0_i32_0 = arith.constant 0 : i32
    %c0_i32_1 = arith.constant 0 : i32
    return %c0_i32, %c0_i32_0 : i32, i32
  }
  func.func @transform_1(%arg0: i32, %arg1: i32) -> (i32, i32) {
    %c0_i32 = arith.constant 0 : i32
    %c0_i32_0 = arith.constant 0 : i32
    return %c0_i32, %arg1 : i32, i32
  }
  func.func @transform_2(%arg0: i32, %arg1: i32) -> (i32, i32, i32) {
    %c0_i32 = arith.constant 0 : i32
    %c0_i32_0 = arith.constant 0 : i32
    return %arg0, %c0_i32, %arg1 : i32, i32, i32
  }
  func.func @transform_3(%arg0: i32, %arg1: i32) -> (i32, i32, i32) {
    %c0_i32 = arith.constant 0 : i32
    %c0_i32_0 = arith.constant 0 : i32
    return %arg0, %c0_i32, %arg1 : i32, i32, i32
  }
}

</mosaic_0001>

<bundles_post_ra>
// kernel: tpu_custom_call.1
= control target key start
LH: loop header
LB: loop body
LE: loop exit
PB: predicated region body
PF: predicated region fallthrough
CT: control target
= control target key end

     0   :  { %s888_s0 = inlined_call_operand.hbm [shape: f32[2,16], index: 0, kind: input, shape index: {}]   ;;  %s889_s1 = inlined_call_operand.hbm [shape: f32[2,256], index: 1, kind: input, shape index: {}]   ;;  %s890_s2 = inlined_call_operand.vmem [shape: f32[2,1,256], index: 2, kind: input, shape index: {}]   ;;  %s891_s3 = inlined_call_operand.vmem [shape: f32[2,3,256], index: 3, kind: output, shape index: {}]  }
   0x1   :  { %895 = sst [smem:[#allocation8_spill]] %s888_s0 }
   0x2   :  { %8 = vsyncpa [#allocation4], 0 }
   0x3   :  { %9 = vsyncpa [#allocation3], 0 }
   0x4   :  { %11 = vsyncpa [#allocation3 + $0x1], 0  ;;  %s679_s12 = smov 0   ;;  %s681_s13 = smov 0  }
   0x5   :  { %s683_s14 = smov 0   ;;  %s685_s15 = smov 0  }
   0x6   :  { %s687_s16 = smov 0   ;;  %s689_s17 = smov 0  }
   0x7   :  { %s691_s18 = smov 0   ;;  %s693_s19 = smov 0  }
   0x8 LB: > { %s442_s20 = sadd.s32 4294967295, %s655_s19   ;;  %p70_p0 = scmp.ne.s32.totalorder %s631_s13, %s627_s12  ;;  %s655_s19 = sphi %s693_s19, %s17_s19   ;;  %s651_s18 = sphi %s691_s18, %s911_s18   ;;  %s647_s17 = sphi %s689_s17, %s910_s17   ;;  %s643_s16 = sphi %s687_s16, %s909_s16   ;;  %s639_s15 = sphi %s685_s15, %s908_s15   ;;  %s635_s14 = sphi %s683_s14, %s907_s14   ;;  %s631_s13 = sphi %s681_s13, %s906_s13   ;;  %s627_s12 = sphi %s679_s12, %s905_s12  }
   0x9   : > { %p719_p1 = scmp.eq.s32.totalorder %s442_s20, 0  ;;  %p444_p2 = scmp.ge.s32.totalorder %s655_s19, 1 }
   0xa   : > { %p137_p3 = scmp.lt.s32.totalorder %s655_s19, 5  ;;  %s26_s24 = sadd.s32 1, %s647_s17 }
   0xb   : > { %s896_s21 = scalar_select %p719_p1, 1, 0 }
   0xc   : > { %p727_p4 = por %p719_p1, %p70_p0  ;;  %p731_p5 = pnand %p444_p2, %p137_p3 }
   0xd   : > { %s29_s25 = sadd.s32 1, %s651_s18  ;;  %p27_p8 = scmp.ge.s32.totalorder %s26_s24, 2 }
   0xe   : > { %s897_s22 = scalar_select %p727_p4, 1, 0 }
   0xf   : > { %p464_p6 = pneg %p731_p5  ;;  %s899_s0 = sld [smem:[#allocation8_spill]] }
  0x11   : > { %p465_p7 = pnand %p464_p6, %p719_p1 }
  0x13   : > { %p544_p10 = pneg %p465_p7 }
  0x15   : > { %s542_s28 = scalar_lea.hbm %s899_s0, 32 }
  0x16   : > { %p543_p9 = scmp.ne.s32.totalorder %s899_s0, %s542_s28  ;;  %p549_p13 = scmp.lt.u32.totalorder %s542_s28, %s899_s0 }
  0x18   : > { %p545_p11 = pnand %p544_p10, %p543_p9 }
  0x1a   : > { %p546_p12 = pneg %p545_p11 }
  0x1c   : > { %p551_p0 = pnand %p549_p13, %p546_p12 }
  0x1e   : > { %554 = shalt.err (!%p551_p0)
}
  0x1f   : > { %s657_s6 = smov [#allocation2]   ;;  %s913_s24 = smov (%p27_p8, %s26_s24), 0 }
  0x20   : > { %467 = dma.hbm_to_smem (!%p465_p7), %s899_s0, 32, %s657_s6, [#allocation4]  }
  0x21   : > { %s915_s25 = smov (!%p27_p8, %s29_s25), %s651_s18  ;;  %s54_s9 = ssub.s32 %s647_s17, %s913_s24 }
  0x22   : > { %s57_s10 = sadd.s32 1, %s635_s14  ;;  %p31_p2 = scmp.ge.s32.totalorder %s915_s25, 2 }
  0x23   : > { %p55_p3 = scmp.eq.s32.totalorder %s54_s9, 0  ;;  %p64_p6 = scmp.ne.s32.totalorder %s635_s14, %s631_s13 }
  0x24   : > { %p65_p9 = scmp.eq.s32.totalorder %s655_s19, 0  ;;  %s917_s25 = smov (%p31_p2, %s915_s25), 0 }
  0x25   : > { %s765_s11 = scalar_select %p55_p3, %s635_s14, %s57_s10  }
  0x26   : > { %p66_p10 = por %p65_p9, %p64_p6  ;;  %p473_p11 = scmp.lt.s32.totalorder %s655_s19, 4 }
  0x27   : > { %s159_s12 = sand.u32 1, %s635_s14   ;;  %s448_s20 = sshll.u32 %s647_s17, 5 }
  0x28   : > { %s447_s26 = sshll.u32 %s159_s12, 1  ;;  %s773_s29 = scalar_lea.hbm %s889_s1, %s448_s20 }
  0x29   : > { %s163_s30 = scalar_lea.vmem [#allocation5], %s447_s26  ;;  %p775_p7 = pnand %p473_p11, %p66_p10 }
  0x2a   : > { %s170_s4 = sshll.u32 %s163_s30, 4  ;;  %s160_s6 = scalar_lea.sflag [#allocation3], %s159_s12  ;;  %s779_s4 = int_to_ptr.vmem [resolvable:$true] %s170_s4 }
  0x2b   : > { %s555_s7 = scalar_lea.hbm %s773_s29, 32  ;;  %p557_p12 = pneg %p775_p7 }
  0x2c   : > { %p556_p8 = scmp.ne.s32.totalorder %s773_s29, %s555_s7  ;;  %s560_s10 = scalar_lea.hbm %s889_s1, 64 }
  0x2d   : > { %p561_p2 = scmp.lt.u32.totalorder %s773_s29, %s889_s1  ;;  %p562_p3 = scmp.lt.u32.totalorder %s560_s10, %s555_s7 }
  0x2e   : > { %p558_p13 = pnand %p557_p12, %p556_p8  ;;  %p564_p9 = scmp.lt.u32.totalorder %s555_s7, %s773_s29 }
  0x2f   : > { %p563_p6 = por %p562_p3, %p561_p2 }
  0x30   : > { %p559_p0 = pneg %p558_p13 }
  0x31   : > { %p565_p10 = por %p564_p9, %p563_p6 }
  0x33   : > { %p566_p11 = pnand %p565_p10, %p559_p0 }
  0x35   : > { %569 = shalt.err (!%p566_p11)
}
  0x36   : > { %s570_s12 = scalar_lea.vmem %s779_s4, 32  ;;  %s658_s27 = smov [#allocation5]  }
  0x37   : > { %p571_p8 = scmp.ne.s32.totalorder %s779_s4, %s570_s12  ;;  %s575_s28 = sshll.u32 %s658_s27, 4  ;;  %s576_s28 = int_to_ptr.vmem [resolvable:$false] %s575_s28 }
  0x38   : > { %s577_s30 = scalar_lea.vmem %s576_s28, 64  ;;  %p578_p1 = scmp.lt.s32.totalorder %s779_s4, %s576_s28 }
  0x39   : > { %p573_p13 = pnand %p571_p8, %p557_p12  ;;  %p579_p2 = scmp.lt.s32.totalorder %s577_s30, %s570_s12 }
  0x3b   : > { %p574_p4 = pneg %p573_p13  ;;  %p580_p3 = por %p579_p2, %p578_p1 }
  0x3d   : > { %p581_p6 = pnand %p580_p3, %p574_p4 }
  0x3f   : > { %584 = shalt.err (!%p581_p6)
}
  0x40   : > { %471 = dma.hbm_to_vmem [thread:$0]  (!%p775_p7), %s773_s29, 32, %s779_s4, %s160_s6  }
  0x41   : > { %189 = sbr.rel (%p731_p5) target bundleno = 125 (0x7d), region = 32  ;;  %p901_p12 = scmp.ne.s32.totalorder (!%p731_p5), %s896_s21, 0 }
  0x48   : > { %618 = dma.done.wait (%p901_p12), [#allocation4], 32  }
  0x49   : > { %620 = vsyncadd (%p901_p12), [#allocation4], 4294967264  ;;  %s195_s7 = sand.u32 1, %s631_s13   ;;  %p902_p1 = scmp.ne.s32.totalorder %s897_s22, 0 }
  0x4a   : > { %s451_s8 = sshll.u32 %s195_s7, 1  ;;  %s196_s9 = scalar_lea.sflag [#allocation3], %s195_s7 }
  0x4b   : > { %s199_s10 = scalar_lea.vmem [#allocation5], %s451_s8 }
  0x4c   : > { %622 = dma.done.wait (%p902_p1), %s196_s9, 32  }
  0x4d   : > { %624 = vsyncadd (%p902_p1), %s196_s9, 4294967264 }
  0x4e   : > { %204 = sfence }
  0x4f   : > { %p233_p4 = scmp.lt.s32.totalorder %s643_s16, 1  ;;  %p235_p5 = scmp.lt.s32.totalorder %s639_s15, 1  ;;  %v249_v0 = vld [vmem:[%s199_s10 + $0x1] sm:$0x1]  ;;  %v248_v3 = vld [vmem:[%s199_s10] sm:$0x1] }
  0x50   : > { %s828_s22 = sshll.u32 %s643_s16, 7 }
  0x51   : > { %s234_s21 = scalar_select %p233_p4, %s643_s16, 1 }
  0x52   : > { %s919_s15 = smov (!%p235_p5, %s639_s15), 1  ;;  %s259_s20 = sadd.s32 1, %s828_s22 }
  0x53   : > { %s452_s23 = sshll.u32 %s234_s21, 1  ;;  %s834_s26 = sld [smem:[#allocation2 + %s259_s20]] }
  0x54   : > { %s821_s29 = sadd.s32 %s452_s23, %s919_s15  ;;  %s832_s15 = sld [smem:[#allocation2 + %s828_s22]] }
  0x55   : > { %s239_s6 = scalar_lea.vmem %s890_s2, %s821_s29  ;;  %s264_s12 = sadd.s32 2, %s828_s22 }
  0x56   : > { %v250_v1 = vld [vmem:[%s239_s6] sm:$0x1]  ;;  %s273_s27 = sadd.s32 4, %s828_s22  ;;  %s277_s16 = sadd.s32 5, %s828_s22 }
  0x57   : > { %v252_v2 = vmul.f32 %v250_v1, %v249_v0  ;;  %s291_s28 = sadd.s32 8, %s828_s22  ;;  %s295_s30 = sadd.s32 9, %s828_s22  ;;  %v251_v4 = vmul.f32 %v250_v1, %v248_v3  ;;  %v254_v6 = vsub.f32 0.0, %v250_v1 }
  0x58   : > { %s292_s7 = sld [smem:[#allocation2 + %s291_s28]]  ;;  %s300_s9 = sadd.s32 10, %s828_s22 }
  0x59   : > { %s296_s8 = sld [smem:[#allocation2 + %s295_s30]]  ;;  %s305_s21 = sadd.s32 11, %s828_s22  ;;  %v253_v5 = vsub.f32 0.0, %v252_v2  ;;  %v261_v15 = vstv %s834_s26 }
  0x5a   : > { %s301_s23 = sld [smem:[#allocation2 + %s300_s9]]  ;;  %s282_s20 = sadd.s32 6, %s828_s22  ;;  %v257_v14 = vstv %s832_s15 }
  0x5b   : > { %s306_s4 = sld [smem:[#allocation2 + %s305_s21]]  ;;  %v258_v20 = vmul.f32 %v257_v14, %v251_v4  ;;  %v262_v21 = vmul.f32 %v261_v15, %v253_v5 }
  0x5c   : > { %s274_s5 = sld [smem:[#allocation2 + %s273_s27]]  ;;  %s269_s27 = sadd.s32 3, %s828_s22 }
  0x5d   : > { %s278_s6 = sld [smem:[#allocation2 + %s277_s16]]  ;;  %s287_s16 = sadd.s32 7, %s828_s22  ;;  %v263_v28 = vadd.f32 %v262_v21, %v258_v20 }
  0x5e   : > { %s265_s0 = sld [smem:[#allocation2 + %s264_s12]]  ;;  %v293_v7 = vstv %s292_s7  ;;  %s454_s12 = sshll.u32 %s821_s29, 2 }
  0x5f   : > { %v297_v8 = vstv %s296_s8  ;;  %v294_v9 = vmul.f32 %v293_v7, %v251_v4  ;;  %s283_s10 = sld [smem:[#allocation2 + %s282_s20]]  ;;  %s247_s22 = scalar_lea.vmem %s891_s3, %s454_s12 }
  0x60   : > { %v298_v10 = vmul.f32 %v297_v8, %v253_v5  ;;  %v302_v11 = vstv %s301_s23  ;;  %s270_s28 = sld [smem:[#allocation2 + %s269_s27]] }
  0x61   : > { %v303_v13 = vmul.f32 %v302_v11, %v254_v6  ;;  %v307_v16 = vstv %s306_s4  ;;  %s288_s30 = sld [smem:[#allocation2 + %s287_s16]] }
  0x62   : > { %v299_v12 = vadd.f32 %v298_v10, %v294_v9  ;;  %v275_v17 = vstv %s274_s5 }
  0x63   : > { %v279_v18 = vstv %s278_s6  ;;  %v276_v24 = vmul.f32 %v275_v17, %v251_v4 }
  0x64   : > { %v304_v19 = vadd.f32 %v303_v13, %v299_v12  ;;  %v266_v23 = vstv %s265_s0  ;;  %v280_v25 = vmul.f32 %v279_v18, %v253_v5 }
  0x65   : > { %v284_v27 = vstv %s283_s10  ;;  %v267_v29 = vmul.f32 %v266_v23, %v254_v6 }
  0x66   : > { %v308_v22 = vadd.f32 %v307_v16, %v304_v19  ;;  %v281_v32 = vadd.f32 %v280_v25, %v276_v24  ;;  %v285_v33 = vmul.f32 %v284_v27, %v254_v6  ;;  %v271_v38 = vstv %s270_s28 }
  0x67   : > { %v268_v36 = vadd.f32 %v267_v29, %v263_v28  ;;  %v289_v39 = vstv %s288_s30 }
  0x68   : > { %v309_v26 = vand.u32 2147483647, %v308_v22  ;;  %v286_v37 = vadd.f32 %v285_v33, %v281_v32 }
  0x69   : > { %v272_v40 = vadd.f32 %v271_v38, %v268_v36 }
  0x6a   : > { %vm849_vm0 = vcmp.lt.f32.partialorder %v309_v26, 0.01  ;;  %v290_v41 = vadd.f32 %v289_v39, %v286_v37 }
  0x6b   : > { %v311_v31 = vsel %vm849_vm0, 0.01, %v308_v22  ;;  %v318_v34 = vsel %vm849_vm0, -10.0, %v308_v22 }
  0x6c   : > { %540 = vrcp.f32 %v311_v31  ;;  %v319_v35 = vmul.f32 -1.0, %v318_v34 }
  0x6e   : > { %322 = vst [vmem:[%s247_s22 + $0x2] sm:$0x1] %v319_v35 }
  0x76   : > { %v541_v42 = vpop.eup %540 }
  0x77   : > { %v313_v43 = vmul.f32 %v541_v42, %v272_v40  ;;  %v315_v44 = vmul.f32 %v541_v42, %v290_v41 }
  0x79   : > { %v314_v45 = vsel %vm849_vm0, -10.0, %v313_v43  ;;  %v316_v46 = vsel %vm849_vm0, -10.0, %v315_v44 }
  0x7a   : > { %320 = vst [vmem:[%s247_s22] sm:$0x1] %v314_v45  ;;  %v317_v47 = vmul.f32 -1.0, %v316_v46 }
  0x7c   : > { %321 = vst [vmem:[%s247_s22 + $0x1] sm:$0x1] %v317_v47 }
  0x7d PF: > { %s17_s19 = sadd.s32 1, %s655_s19   ;;  %s905_s12 = smov %s631_s13 }
  0x7e   : > { %p14_p7 = scmp.ge.s32.totalorder %s17_s19, 6   ;;  %s906_s13 = smov %s635_s14 }
  0x7f   : > { %s907_s14 = smov %s765_s11  ;;  %s908_s15 = smov %s647_s17 }
  0x80   : > { %s909_s16 = smov %s651_s18  ;;  %s910_s17 = smov %s913_s24 }
  0x81   : > { %s911_s18 = smov %s917_s25  ;;  %16 = sbr.rel (!%p14_p7) target bundleno = 8 (0x8), region = 80 }
  0x88   :  { %350 = vsyncpa [#allocation3], 1 }
  0x89   :  { %352 = vsyncpa [#allocation3 + $0x1], 1 }
  0x8a   :  { %353 = vsyncpa [#allocation4], 1 }
  0x8b   :  { %355 = vsyncpa [#allocation4 + $0x1], 1 }

</bundles_post_ra>
